<compile_context>
chip_gen: v7x
topology: tpu7x:2x2x1
jax: 0.10.0
libtpu: 0.0.40
codegen_flags: <defaults>
</compile_context>

<pallas_src>
import functools

import jax
import jax.numpy as jnp
from jax.experimental import pallas as pl
from jax.experimental.pallas import tpu as pltpu


def _bntt_kernel(x_ref, w_ref, b_ref, *rest, eps, variant, inv_count):
    """x_ref/o_ref: (N, L) with L = cblk*T folded onto lanes; w/b: (1, L).

    For BNTTv1, rest = (R_ref, Rt_ref, o_ref) with R the (L, cblk) 0/1
    segment-indicator matrix; for BNTTv2, rest = (o_ref,).
    """
    o_ref = rest[-1]
    xf = x_ref[...].astype(jnp.float32)                    # (N, L)
    sum_n = jnp.sum(xf, axis=0, keepdims=True)             # (1, L)

    if variant == "BNTTv1":
        r_ref, rt_ref = rest[0], rest[1]

        def seg_reduce_bcast(v):
            # (1, L) -> per-channel total broadcast back to that channel's T lanes.
            per_c = jnp.dot(v, r_ref[...],
                            preferred_element_type=jnp.float32,
                            precision=jax.lax.Precision.HIGHEST)      # (1, cblk)
            return jnp.dot(per_c, rt_ref[...],
                           preferred_element_type=jnp.float32,
                           precision=jax.lax.Precision.HIGHEST)       # (1, L)

        mean = seg_reduce_bcast(sum_n) * inv_count
        diff = xf - mean                                             # (N, L)
        ssd_n = jnp.sum(diff * diff, axis=0, keepdims=True)          # (1, L)
        var = seg_reduce_bcast(ssd_n) * inv_count
    else:  # BNTTv2: per-(channel, timestep) stats over N only.
        mean = sum_n * inv_count
        diff = xf - mean
        var = jnp.sum(diff * diff, axis=0, keepdims=True) * inv_count

    rstd = jax.lax.rsqrt(var + eps)                        # EUP, off the VALU path
    scale = w_ref[...].astype(jnp.float32) * rstd          # (1, L)
    o_ref[...] = (diff * scale + b_ref[...].astype(jnp.float32)).astype(o_ref.dtype)


def _tpu_vmem_bytes():
    try:
        return int(pltpu.get_tpu_info().vmem_capacity_bytes)
    except Exception:
        return 64 << 20        # conservative default (v7x-class TensorCore)


def _choose_cblk(n, c, t, itemsize, tile_budget, need_r, r_budget=1 << 20):
    """Channels per block.  Legal multi-block split needs cblk | C and
    (cblk*T) % 128 == 0 so every lane block is aligned and dense."""
    cands = [d for d in range(1, c + 1) if c % d == 0 and (d * t) % 128 == 0]
    if not cands:
        # No lane-aligned split of C exists: one full-extent block (always legal).
        return c

    def fits(d):
        if n * d * t * itemsize > tile_budget:
            return False
        if need_r and 2 * (d * d * t * 4) > r_budget:   # R + R^T bytes
            return False
        return True

    fitting = [d for d in cands if fits(d)]
    if not fitting:
        # TODO(synk): T/N-split accumulation path; for now take the smallest
        # lane-aligned block and rely on the raised vmem limit.
        return min(cands)

    # Prefer enough grid steps for pipelining (and an even count so v7x's two
    # TensorCores both get work), then the largest tile within that tier.
    for min_blocks in (8, 4, 2, 1):
        sub = [d for d in fitting if (c // d) >= min_blocks]
        if sub:
            even = [d for d in sub if (c // d) % 2 == 0]
            return max(even or sub)
    return max(fitting)


def bntt1d_forward(x_nct, weight_tc, bias_tc, *, eps=1e-4, variant="BNTTv1"):
    """x_nct: (N, C, T) as in PyTorch.  weight_tc/bias_tc: (T, C).  Returns (N, C, T)."""
    n, c, t = x_nct.shape
    assert weight_tc.shape == (t, c) and bias_tc.shape == (t, c)

    # PyTorch falls back to the v1 code path when batch size is 1.
    eff_variant = "BNTTv1" if (variant == "BNTTv1" or n == 1) else "BNTTv2"
    inv_count = 1.0 / float(n * t) if eff_variant == "BNTTv1" else 1.0 / float(n)
    need_r = eff_variant == "BNTTv1"

    itemsize = jnp.dtype(x_nct.dtype).itemsize
    vmem_phys = _tpu_vmem_bytes()
    if vmem_phys >= (100 << 20):        # 128 MiB parts (v5e / v6e)
        tile_budget, vmem_cap = 20 << 20, 100 << 20
    else:                               # 64 MiB parts (v7x-class)
        tile_budget, vmem_cap = 8 << 20, 48 << 20

    cblk = _choose_cblk(n, c, t, itemsize, tile_budget, need_r)
    L = cblk * t
    grid = (c // cblk,)

    # Free reshapes only: x stays in native NCT memory order (lane j of the
    # folded view is channel j//T, timestep j%T); only the tiny (T, C) params
    # are transposed.
    x2 = x_nct.reshape(n, c * t)
    w_flat = jnp.transpose(weight_tc).reshape(1, c * t)
    b_flat = jnp.transpose(bias_tc).reshape(1, c * t)

    in_specs = [
        pl.BlockSpec((n, L), lambda ci: (0, ci)),     # x channel-group tile
        pl.BlockSpec((1, L), lambda ci: (0, ci)),     # folded weight slice
        pl.BlockSpec((1, L), lambda ci: (0, ci)),     # folded bias slice
    ]
    operands = [x2, w_flat, b_flat]
    if need_r:
        # 0/1 segment matrix: R[j, cc] = 1 iff lane j belongs to local channel cc.
        lane_ch = jnp.arange(L, dtype=jnp.int32) // t
        R = (lane_ch[:, None] == jnp.arange(cblk, dtype=jnp.int32)[None, :]
             ).astype(jnp.float32)                    # (L, cblk)
        Rt = jnp.transpose(R)                         # (cblk, L)
        # Constant index map -> DMA'd into VMEM once, resident for all steps.
        in_specs += [pl.BlockSpec((L, cblk), lambda ci: (0, 0)),
                     pl.BlockSpec((cblk, L), lambda ci: (0, 0))]
        operands += [R, Rt]

    # VMEM budget: double-buffered in + out tiles, f32 temporaries (xf, diff),
    # the small R/Rt constants, params and headroom; capped per generation.
    tile_b = n * L * itemsize
    tile_f32 = n * L * 4
    r_b = 2 * (L * cblk * 4) if need_r else 0
    vmem_limit = int(min(max(4 * tile_b + 2 * tile_f32 + 2 * r_b + (6 << 20),
                             16 << 20), vmem_cap))

    kernel = functools.partial(_bntt_kernel, eps=float(eps),
                               variant=eff_variant, inv_count=inv_count)

    out2 = pl.pallas_call(
        kernel,
        out_shape=jax.ShapeDtypeStruct((n, c * t), x_nct.dtype),
        grid=grid,
        in_specs=in_specs,
        out_specs=pl.BlockSpec((n, L), lambda ci: (0, ci)),
        compiler_params=pltpu.CompilerParams(
            dimension_semantics=("parallel",),   # channel groups are independent
            vmem_limit_bytes=vmem_limit,
        ),
    )(*operands)
    return out2.reshape(n, c, t)


def _reference(x_nct, weight_tc, bias_tc, eps, variant):
    """Plain-JAX reference mirroring the PyTorch forward (training mode)."""
    n, c, t = x_nct.shape
    if variant == "BNTTv1" or n == 1:
        mean = jnp.mean(x_nct, axis=(0, 2), keepdims=True)             # (1,C,1)
        var = jnp.mean((x_nct - mean) ** 2, axis=(0, 2), keepdims=True)
        xhat = (x_nct - mean) / jnp.sqrt(var + eps)
        return xhat * weight_tc.T[None] + bias_tc.T[None]
    else:  # BNTTv2
        mean = jnp.mean(x_nct, axis=0, keepdims=True)                  # (1,C,T)
        var = jnp.mean((x_nct - mean) ** 2, axis=0, keepdims=True)
        xhat = (x_nct - mean) / jnp.sqrt(var + eps)
        return xhat * weight_tc.T[None] + bias_tc.T[None]


if __name__ == "__main__":
    eps = 1e-4
    key = jax.random.PRNGKey(0)

    # Small shapes consistent with the module.  The (2, 4, 8) case exercises the
    # single full-extent block fallback; (4, 32, 16) exercises the lane-aligned
    # multi-block grid (+ segment-matrix path for BNTTv1).
    cases = [
        ("BNTTv1", (2, 4, 8)),
        ("BNTTv2", (2, 4, 8)),
        ("BNTTv1", (4, 32, 16)),
        ("BNTTv2", (4, 32, 16)),
    ]

    ok = True
    for variant, (N, C, T) in cases:
        key, kx, kw, kb = jax.random.split(key, 4)
        x = jax.random.normal(kx, (N, C, T), dtype=jnp.float32)
        # PyTorch default affine is w=1, b=0; perturb so the per-timestep affine
        # path is actually exercised.
        weight = 1.0 + 0.1 * jax.random.normal(kw, (T, C), dtype=jnp.float32)
        bias = 0.1 * jax.random.normal(kb, (T, C), dtype=jnp.float32)

        out = jax.block_until_ready(
            bntt1d_forward(x, weight, bias, eps=eps, variant=variant))
        ref = _reference(x, weight, bias, eps, variant)
        if not jnp.allclose(out, ref, atol=1e-4, rtol=1e-4):
            ok = False
            print(f"MISMATCH {variant} N,C,T={N},{C},{T}: max err "
                  f"{float(jnp.max(jnp.abs(out - ref)))}")

    if ok:
        print("KERNEL_OK")
</pallas_src>

<mosaic_0001>
module attributes {stable_mosaic.version = 11 : i64} {
  func.func @_bntt_kernel(%arg0: i32, %arg1: memref<2x32xf32, #tpu.memory_space<vmem>>, %arg2: memref<1x32xf32, #tpu.memory_space<vmem>>, %arg3: memref<1x32xf32, #tpu.memory_space<vmem>>, %arg4: memref<32x4xf32, #tpu.memory_space<vmem>>, %arg5: memref<4x32xf32, #tpu.memory_space<vmem>>, %arg6: memref<2x32xf32, #tpu.memory_space<vmem>>) attributes {dimension_semantics = [#tpu.dimension_semantics<parallel>], iteration_bounds = array<i64: 1>, scalar_prefetch = 0 : i64, scratch_operands = 0 : i64, tpu.core_type = #tpu.core_type<tc>, window_params = [{transform_indices = @transform_0, window_bounds = array<i64: 2, 32>}, {transform_indices = @transform_1, window_bounds = array<i64: 1, 32>}, {transform_indices = @transform_2, window_bounds = array<i64: 1, 32>}, {pipeline_mode = #tpu.pipeline_mode<synchronous>, transform_indices = @transform_3, window_bounds = array<i64: 32, 4>}, {pipeline_mode = #tpu.pipeline_mode<synchronous>, transform_indices = @transform_4, window_bounds = array<i64: 4, 32>}, {transform_indices = @transform_5, window_bounds = array<i64: 2, 32>}]} {
    %c0 = arith.constant 0 : index
    %c0_0 = arith.constant 0 : index
    %0 = vector.load %arg1[%c0, %c0_0] : memref<2x32xf32, #tpu.memory_space<vmem>>, vector<2x32xf32>
    %cst = arith.constant dense<0.000000e+00> : vector<32xf32>
    %1 = vector.multi_reduction <add>, %0, %cst [0] : vector<2x32xf32> to vector<32xf32>
    %2 = vector.shape_cast %1 : vector<32xf32> to vector<1x32xf32>
    %c0_1 = arith.constant 0 : index
    %c0_2 = arith.constant 0 : index
    %3 = vector.load %arg4[%c0_1, %c0_2] : memref<32x4xf32, #tpu.memory_space<vmem>>, vector<32x4xf32>
    %cst_3 = arith.constant dense<0.000000e+00> : vector<1x4xf32>
    %4 = tpu.matmul %2, %3, %cst_3 {dimension_numbers = #tpu.dot_dimension_numbers<[1], [0], [0], [1], [0, 0, 1, 1], [], []>, precision = #tpu.contract_precision<fp32>} : vector<1x32xf32>, vector<32x4xf32>, vector<1x4xf32> -> vector<1x4xf32>
    %c0_4 = arith.constant 0 : index
    %c0_5 = arith.constant 0 : index
    %5 = vector.load %arg5[%c0_4, %c0_5] : memref<4x32xf32, #tpu.memory_space<vmem>>, vector<4x32xf32>
    %cst_6 = arith.constant dense<0.000000e+00> : vector<1x32xf32>
    %6 = tpu.matmul %4, %5, %cst_6 {dimension_numbers = #tpu.dot_dimension_numbers<[1], [0], [0], [1], [0, 0, 1, 1], [], []>, precision = #tpu.contract_precision<fp32>} : vector<1x4xf32>, vector<4x32xf32>, vector<1x32xf32> -> vector<1x32xf32>
    %cst_7 = arith.constant 6.250000e-02 : f32
    %7 = vector.broadcast %cst_7 : f32 to vector<1x32xf32>
    %8 = arith.mulf %6, %7 : vector<1x32xf32>
    %9 = vector.broadcast %8 : vector<1x32xf32> to vector<2x32xf32>
    %10 = arith.subf %0, %9 : vector<2x32xf32>
    %11 = arith.mulf %10, %10 : vector<2x32xf32>
    %cst_8 = arith.constant dense<0.000000e+00> : vector<32xf32>
    %12 = vector.multi_reduction <add>, %11, %cst_8 [0] : vector<2x32xf32> to vector<32xf32>
    %13 = vector.shape_cast %12 : vector<32xf32> to vector<1x32xf32>
    %c0_9 = arith.constant 0 : index
    %c0_10 = arith.constant 0 : index
    %14 = vector.load %arg4[%c0_9, %c0_10] : memref<32x4xf32, #tpu.memory_space<vmem>>, vector<32x4xf32>
    %cst_11 = arith.constant dense<0.000000e+00> : vector<1x4xf32>
    %15 = tpu.matmul %13, %14, %cst_11 {dimension_numbers = #tpu.dot_dimension_numbers<[1], [0], [0], [1], [0, 0, 1, 1], [], []>, precision = #tpu.contract_precision<fp32>} : vector<1x32xf32>, vector<32x4xf32>, vector<1x4xf32> -> vector<1x4xf32>
    %c0_12 = arith.constant 0 : index
    %c0_13 = arith.constant 0 : index
    %16 = vector.load %arg5[%c0_12, %c0_13] : memref<4x32xf32, #tpu.memory_space<vmem>>, vector<4x32xf32>
    %cst_14 = arith.constant dense<0.000000e+00> : vector<1x32xf32>
    %17 = tpu.matmul %15, %16, %cst_14 {dimension_numbers = #tpu.dot_dimension_numbers<[1], [0], [0], [1], [0, 0, 1, 1], [], []>, precision = #tpu.contract_precision<fp32>} : vector<1x4xf32>, vector<4x32xf32>, vector<1x32xf32> -> vector<1x32xf32>
    %cst_15 = arith.constant 6.250000e-02 : f32
    %18 = vector.broadcast %cst_15 : f32 to vector<1x32xf32>
    %19 = arith.mulf %17, %18 : vector<1x32xf32>
    %cst_16 = arith.constant 9.99999974E-5 : f32
    %20 = vector.broadcast %cst_16 : f32 to vector<1x32xf32>
    %21 = arith.addf %19, %20 : vector<1x32xf32>
    %22 = math.rsqrt %21 : vector<1x32xf32>
    %c0_17 = arith.constant 0 : index
    %c0_18 = arith.constant 0 : index
    %23 = vector.load %arg2[%c0_17, %c0_18] : memref<1x32xf32, #tpu.memory_space<vmem>>, vector<1x32xf32>
    %24 = arith.mulf %23, %22 : vector<1x32xf32>
    %25 = vector.broadcast %24 : vector<1x32xf32> to vector<2x32xf32>
    %26 = arith.mulf %10, %25 : vector<2x32xf32>
    %c0_19 = arith.constant 0 : index
    %c0_20 = arith.constant 0 : index
    %27 = vector.load %arg3[%c0_19, %c0_20] : memref<1x32xf32, #tpu.memory_space<vmem>>, vector<1x32xf32>
    %28 = vector.broadcast %27 : vector<1x32xf32> to vector<2x32xf32>
    %29 = arith.addf %26, %28 : vector<2x32xf32>
    %c0_21 = arith.constant 0 : index
    %c0_22 = arith.constant 0 : index
    %30 = vector.load %arg6[%c0_21, %c0_22] : memref<2x32xf32, #tpu.memory_space<vmem>>, vector<2x32xf32>
    tpu.vector_store %arg6[%c0_21, %c0_22], %29 {strides = array<i32>} : memref<2x32xf32, #tpu.memory_space<vmem>>, vector<2x32xf32>,
    return
  }
  func.func @transform_0(%arg0: i32) -> (i32, i32) {
    %c0_i32 = arith.constant 0 : i32
    %c0_i32_0 = arith.constant 0 : i32
    return %c0_i32, %arg0 : i32, i32
  }
  func.func @transform_1(%arg0: i32) -> (i32, i32) {
    %c0_i32 = arith.constant 0 : i32
    %c0_i32_0 = arith.constant 0 : i32
    return %c0_i32, %arg0 : i32, i32
  }
  func.func @transform_2(%arg0: i32) -> (i32, i32) {
    %c0_i32 = arith.constant 0 : i32
    %c0_i32_0 = arith.constant 0 : i32
    return %c0_i32, %arg0 : i32, i32
  }
  func.func @transform_3(%arg0: i32) -> (i32, i32) {
    %c0_i32 = arith.constant 0 : i32
    %c0_i32_0 = arith.constant 0 : i32
    %c0_i32_1 = arith.constant 0 : i32
    return %c0_i32, %c0_i32_0 : i32, i32
  }
  func.func @transform_4(%arg0: i32) -> (i32, i32) {
    %c0_i32 = arith.constant 0 : i32
    %c0_i32_0 = arith.constant 0 : i32
    %c0_i32_1 = arith.constant 0 : i32
    return %c0_i32, %c0_i32_0 : i32, i32
  }
  func.func @transform_5(%arg0: i32) -> (i32, i32) {
    %c0_i32 = arith.constant 0 : i32
    %c0_i32_0 = arith.constant 0 : i32
    return %c0_i32, %arg0 : i32, i32
  }
}

</mosaic_0001>

<bundles_post_ra>
// kernel: tpu_custom_call.1
= control target key start
LH: loop header
LB: loop body
LE: loop exit
PB: predicated region body
PF: predicated region fallthrough
CT: control target
= control target key end

     0   :  { %v2383_v3 = vmov 0.0|0.0   ;;  %vm2384_vm0 = vmmov 0   ;;  %v2385_v8 = vmov 0.0   ;;  %vm22_vm1 = vcmask 254976   ;;  %s2624_s0 = inlined_call_operand.vmem [shape: f32[2,32], index: 0, kind: input, shape index: {}]   ;;  %s2625_s1 = inlined_call_operand.vmem [shape: f32[1,32], index: 1, kind: input, shape index: {}]   ;;  %s2626_s2 = inlined_call_operand.vmem [shape: f32[1,32], index: 2, kind: input, shape index: {}]   ;;  %s2627_s3 = inlined_call_operand.vmem [shape: f32[32,4], index: 3, kind: input, shape index: {}]   ;;  %s2628_s4 = inlined_call_operand.vmem [shape: f32[4,32], index: 4, kind: input, shape index: {}]   ;;  %s2629_s5 = inlined_call_operand.hbm [shape: f32[2,32], index: 5, kind: output, shape index: {}]  }
   0x1   :  { %v30_v0 = vld [vmem:[%s2627_s3] sm:$0xff]  ;;  %v31_v1 = vld [vmem:[%s2627_s3 + $0x8] sm:$0xff]  ;;  %v32_v2 = vld [vmem:[%s2627_s3 + $0x10] sm:$0xff]  ;;  %2241 = vmatprep.subr.bf16.mxu0 %v2383_v3  ;;  %2057 = vmatprep.mubr.msk.f32.mxu0 %vm2384_vm0, %v2385_v8 }
   0x2   :  { %v39_v4 = vand.u32 4294901760, %v30_v0  ;;  %v42_v5 = vand.u32 4294901760, %v31_v1  ;;  %v33_v6 = vld [vmem:[%s2627_s3 + $0x18] sm:$0xff]  ;;  %v45_v7 = vand.u32 4294901760, %v32_v2  ;;  %v2435_v9 = vld [vmem:[%s2624_s0] sm:$0x3]  ;;  %2115 = vmatprep.subr.mxu1 %v2385_v8  ;;  %2117 = vmatprep.mubr.msk.f32.mxu1 %vm2384_vm0, %v2385_v8 }
   0x3   :  { %v48_v10 = vand.u32 4294901760, %v33_v6 }
   0x4   :  { %10 = vsyncpa [#allocation3], 0  ;;  %v2440_v11 = vpack.c.bf16 %v42_v5, %v39_v4  ;;  %v23_v12 = vsel %vm22_vm1, %v2435_v9, 0.0  ;;  %v119_v17 = vsub.f32 %v30_v0, %v39_v4  ;;  %v126_v18 = vsub.f32 %v31_v1, %v42_v5  ;;  %v523_v48 = vld [vmem:[%s2628_s4] sm:$0xf]  ;;  %s2386_s6 = smov [#allocation2]  }
   0x5   :  { %v24_v13 = vrot.slane %v23_v12, 4  ;;  %v2445_v14 = vpack.c.bf16 %v48_v10, %v45_v7  ;;  %v133_v20 = vsub.f32 %v32_v2, %v45_v7  ;;  %v140_v24 = vsub.f32 %v33_v6, %v48_v10  ;;  %s1956_s7 = sshll.u32 %s2386_s6, 4  ;;  %s1957_s7 = int_to_ptr.vmem [resolvable:$true] %s1956_s7 }
   0x6   :  { %2243 = vmatpush3.bf16.msra.mxu0 %v2440_v11  ;;  %v120_v22 = vand.u32 4294901760, %v119_v17  ;;  %v127_v23 = vand.u32 4294901760, %v126_v18  ;;  %vm34_vm2 = vcmask 261120   ;;  %v2460_v44 = vpack.c.bf16 %v126_v18, %v119_v17  ;;  %s2359_s8 = scalar_lea.vmem %s1957_s7, 32  ;;  %p2364_p1 = scmp.lt.s32.totalorder %s1957_s7, %s1957_s7 }
   0x7   :  { %2244 = vmatprep.subr.bf16.mxu0 %v2383_v3  ;;  %v25_v15 = vadd.f32 %v24_v13, %v23_v12  ;;  %v134_v26 = vand.u32 4294901760, %v133_v20  ;;  %v141_v30 = vand.u32 4294901760, %v140_v24  ;;  %v2464_v45 = vpack.c.bf16 %v140_v24, %v133_v20  ;;  %p2360_p0 = scmp.ne.s32.totalorder %s1957_s7, %s2359_s8  ;;  %p2365_p2 = scmp.lt.s32.totalorder %s2359_s8, %s2359_s8 }
   0x8   :  { %v121_v28 = vsub.f32 %v119_v17, %v120_v22  ;;  %v128_v29 = vsub.f32 %v126_v18, %v127_v23  ;;  %v2476_v46 = vpack.c.bf16 %v127_v23, %v120_v22  ;;  %vm528_vm3 = vcmask 1043456  }
   0x9   :  { %v26_v16 = vrot.slane %v25_v15, 2  ;;  %v135_v35 = vsub.f32 %v133_v20, %v134_v26  ;;  %v142_v36 = vsub.f32 %v140_v24, %v141_v30  ;;  %v2480_v47 = vpack.c.bf16 %v141_v30, %v134_v26  ;;  %p2366_p3 = por %p2365_p2, %p2364_p1 }
   0xa   :  { %2246 = vmatpush3.bf16.msra.mxu0 %v2445_v14  ;;  %v122_v33 = vand.u32 4294901760, %v121_v28  ;;  %v129_v34 = vand.u32 4294901760, %v128_v29  ;;  %v530_v49 = vsel %vm528_vm3, %v523_v48, 0  ;;  %vm524_vm4 = vcmask 31744  }
   0xb   :  { %2247 = vmatprep.subr.bf16.mxu0 %v2383_v3  ;;  %v27_v19 = vadd.f32 %v26_v16, %v25_v15  ;;  %v136_v40 = vand.u32 4294901760, %v135_v35  ;;  %v143_v41 = vand.u32 4294901760, %v142_v36  ;;  %v2498_v50 = vand.u32 4294901760, %v530_v49  ;;  %p2367_p4 = pnand %p2366_p3, %p2360_p0 }
   0xc   :  { %v2451_v39 = vpack.c.bf16 %v129_v34, %v122_v33  ;;  %v979_v63 = vlaneseq  ;;  %v1932_v34 = vld [vmem:[%s2625_s1] sm:$0x1] }
   0xd   :  { %v28_v21 = vrot.slane %v27_v19, 1  ;;  %v2454_v43 = vpack.c.bf16 %v143_v41, %v136_v40  ;;  %2116 = vmatpush3.msra.mxu1 %v2498_v50  ;;  %v2505_v51 = vsub.f32 %v530_v49, %v2498_v50 }
   0xe   :  { %2120 = vmatprep.subr.mxu1 %v2385_v8  ;;  %v2541_v0 = vshrl.u32 %v979_v63, 7 }
   0xf   :  { %v29_v25 = vadd.f32 %v28_v21, %v27_v19  ;;  %v2509_v55 = vand.u32 4294901760, %v2505_v51 }
  0x10   :  { %v981_v1 = vsub.s32 0, %v2541_v0 }
  0x11   :  { %v36_v27 = vsel %vm34_vm2, %v29_v25, 0  ;;  %v612_v58 = vsub.f32 %v2505_v51, %v2509_v55 }
  0x12   :  { %v107_v31 = vand.u32 4294901760, %v36_v27 }
  0x13   :  { %v2513_v61 = vand.u32 4294901760, %v612_v58 }
  0x14   :  { %v108_v32 = vsub.f32 %v36_v27, %v107_v31 }
  0x16   :  { %v109_v37 = vand.u32 4294901760, %v108_v32 }
  0x18   :  { %v110_v38 = vsub.f32 %v108_v32, %v109_v37 }
  0x1a   :  { %v111_v42 = vand.u32 4294901760, %v110_v38  ;;  %v1964_v38 = vld [vmem:[%s2626_s2] ss:$0 sm:$0xff] }
  0x1c   :  { %2058 = vmatmul.mubr.f32.vlgmr.msra.gmra.mrb[0].mxu0 %v111_v42 }
  0x1d   :  { %2249 = vmatpush3.bf16.msra.mxu0 %v2451_v39  ;;  %2068 = vmatprep.mubr.msk.f32.mxu0 %vm2384_vm0, %v2385_v8 }
  0x1e   :  { %2250 = vmatprep.subr.bf16.mxu0 %v2383_v3 }
  0x21   :  { %2252 = vmatpush3.bf16.msra.mxu0 %v2454_v43 }
  0x22   :  { %2253 = vmatprep.subr.bf16.mxu0 %v2383_v3 }
  0x24   :  { %2069 = vmatmul.mubr.f32.vlgmr.msra.gmra.mrb[0].mxu0 %v107_v31 }
  0x25   :  { %2255 = vmatpush3.bf16.msra.mxu0 %v2460_v44  ;;  %2079 = vmatprep.mubr.msk.f32.mxu0 %vm2384_vm0, %v2385_v8 }
  0x26   :  { %2256 = vmatprep.subr.bf16.mxu0 %v2383_v3 }
  0x29   :  { %2258 = vmatpush3.bf16.msra.mxu0 %v2464_v45 }
  0x2a   :  { %2259 = vmatprep.subr.bf16.mxu0 %v2383_v3 }
  0x2c   :  { %2080 = vmatmul.mubr.f32.vlgmr.msra.gmra.mrb[0].mxu0 %v108_v32 }
  0x2d   :  { %2261 = vmatpush3.bf16.msra.mxu0 %v2440_v11  ;;  %2090 = vmatprep.mubr.msk.f32.mxu0 %vm2384_vm0, %v2385_v8 }
  0x2e   :  { %2262 = vmatprep.subr.bf16.mxu0 %v2383_v3 }
  0x31   :  { %2264 = vmatpush3.bf16.msra.mxu0 %v2445_v14 }
  0x32   :  { %2265 = vmatprep.subr.bf16.mxu0 %v2383_v3 }
  0x34   :  { %2091 = vmatmul.mubr.f32.vlgmr.msra.gmra.mrb[0].mxu0 %v109_v37 }
  0x35   :  { %2267 = vmatpush3.bf16.msra.mxu0 %v2476_v46  ;;  %2101 = vmatprep.mubr.msk.f32.mxu0 %vm2384_vm0, %v2385_v8 }
  0x36   :  { %2268 = vmatprep.subr.bf16.mxu0 %v2383_v3 }
  0x39   :  { %2270 = vmatpush3.bf16.msra.mxu0 %v2480_v47 }
  0x3a   :  { %2271 = vmatprep.subr.bf16.mxu0 %v2383_v3 }
  0x3c   :  { %2102 = vmatmul.mubr.f32.vlgmr.msra.gmra.mrb[0].mxu0 %v107_v31 }
  0x3d   :  { %2273 = vmatpush3.bf16.msra.mxu0 %v2440_v11  ;;  %2112 = vmatprep.mubr.msk.f32.mxu0 %vm2384_vm0, %v2385_v8 }
  0x3e   :  { %2274 = vmatprep.subr.bf16.mxu0 %v2383_v3 }
  0x41   :  { %2276 = vmatpush3.bf16.msra.mxu0 %v2445_v14 }
  0x42   :  { %2211 = vmatprep.subr.mxu0 %v2385_v8 }
  0x44   :  { %2113 = vmatmul.mubr.f32.vlgmr.msra.gmra.mrb[0].mxu0 %v107_v31 }
  0x45   :  { %2213 = vmatprep.mubr.msk.f32.mxu0 %vm2384_vm0, %v2385_v8  ;;  %2212 = vmatpush3.msra.mxu0 %v2498_v50 }
  0x46   :  { %2216 = vmatprep.subr.mxu0 %v2385_v8 }
 0x117   :  { %v519_v52 = vpop.f32.mrb[0].mxu0 }
 0x118   :  { %v526_v53 = vsel %vm524_vm4, %v519_v52, 0  ;;  %v2114_v54 = vpop.f32.mrb[1].mxu0 }
 0x119   :  { %v598_v56 = vand.u32 4294901760, %v526_v53 }
 0x11b   :  { %v599_v57 = vsub.f32 %v526_v53, %v598_v56 }
 0x11d   :  { %v600_v59 = vand.u32 4294901760, %v599_v57 }
 0x11f   :  { %v601_v60 = vsub.f32 %v599_v57, %v600_v59 }
 0x121   :  { %v602_v62 = vand.u32 4294901760, %v601_v60 }
 0x123   :  { %2118 = vmatmul.mubr.f32.vlgmr.msra.gmra.mrb[0].mxu1 %v602_v62 }
 0x124   :  { %2121 = vmatpush3.msra.mxu1 %v2513_v61  ;;  %2122 = vmatprep.mubr.msk.f32.mxu1 %vm2384_vm0, %v2385_v8 }
 0x125   :  { %2125 = vmatprep.subr.mxu1 %v2385_v8 }
 0x12b   :  { %2123 = vmatmul.mubr.f32.vlgmr.msra.gmra.mrb[0].mxu1 %v598_v56 }
 0x12c   :  { %2126 = vmatpush3.msra.mxu1 %v2505_v51  ;;  %2127 = vmatprep.mubr.msk.f32.mxu1 %vm2384_vm0, %v2385_v8 }
 0x12d   :  { %2130 = vmatprep.subr.mxu1 %v2385_v8 }
 0x133   :  { %2128 = vmatmul.mubr.f32.vlgmr.msra.gmra.mrb[0].mxu1 %v599_v57 }
 0x134   :  { %2131 = vmatpush3.msra.mxu1 %v2498_v50  ;;  %2132 = vmatprep.mubr.msk.f32.mxu1 %vm2384_vm0, %v2385_v8 }
 0x135   :  { %2135 = vmatprep.subr.mxu1 %v2385_v8 }
 0x13b   :  { %2133 = vmatmul.mubr.f32.vlgmr.msra.gmra.mrb[0].mxu1 %v600_v59 }
 0x13c   :  { %2136 = vmatpush3.msra.mxu1 %v2509_v55  ;;  %2137 = vmatprep.mubr.msk.f32.mxu1 %vm2384_vm0, %v2385_v8 }
 0x13d   :  { %2140 = vmatprep.subr.mxu1 %v2385_v8 }
 0x143   :  { %2138 = vmatmul.mubr.f32.vlgmr.msra.gmra.mrb[0].mxu1 %v598_v56 }
 0x144   :  { %2141 = vmatpush3.msra.mxu1 %v2498_v50  ;;  %2142 = vmatprep.mubr.msk.f32.mxu1 %vm2384_vm0, %v2385_v8 }
 0x145   :  { %2277 = vmatprep.subr.bf16.mxu1 %v2383_v3 }
 0x14b   :  { %2143 = vmatmul.mubr.f32.vlgmr.msra.gmra.mrb[0].mxu1 %v598_v56 }
 0x14c   :  { %2279 = vmatpush3.bf16.msra.mxu1 %v2440_v11  ;;  %2153 = vmatprep.mubr.msk.f32.mxu1 %vm2384_vm0, %v2385_v8 }
 0x14d   :  { %2280 = vmatprep.subr.bf16.mxu1 %v2383_v3 }
 0x150   :  { %2282 = vmatpush3.bf16.msra.mxu1 %v2445_v14 }
 0x151   :  { %2283 = vmatprep.subr.bf16.mxu1 %v2383_v3 }
 0x21e   :  { %v974_v2 = vpop.f32.mrb[0].mxu1 }
 0x21f   :  { %v978_v4 = vmul.f32 0.0625, %v974_v2  ;;  %v2144_v5 = vpop.f32.mrb[1].mxu1 }
 0x221   :  { %v982_v6 = vrot.slane %v978_v4, %v981_v1 }
 0x223   :  { %v2547_v7 = vsub.f32 %v2435_v9, %v982_v6 }
 0x225   :  { %v984_v10 = vmul.f32 %v2547_v7, %v2547_v7 }
 0x227   :  { %v985_v12 = vsel %vm22_vm1, %v984_v10, 0.0 }
 0x228   :  { %v986_v13 = vrot.slane %v985_v12, 4 }
 0x22a   :  { %v987_v15 = vadd.f32 %v986_v13, %v985_v12 }
 0x22c   :  { %v988_v16 = vrot.slane %v987_v15, 2 }
 0x22e   :  { %v989_v17 = vadd.f32 %v988_v16, %v987_v15 }
 0x230   :  { %v990_v18 = vrot.slane %v989_v17, 1 }
 0x232   :  { %v991_v19 = vadd.f32 %v990_v18, %v989_v17 }
 0x234   :  { %v993_v20 = vsel %vm34_vm2, %v991_v19, 0 }
 0x235   :  { %v1064_v21 = vand.u32 4294901760, %v993_v20 }
 0x237   :  { %v1065_v22 = vsub.f32 %v993_v20, %v1064_v21 }
 0x239   :  { %v1066_v23 = vand.u32 4294901760, %v1065_v22 }
 0x23b   :  { %v1067_v24 = vsub.f32 %v1065_v22, %v1066_v23 }
 0x23d   :  { %v1068_v25 = vand.u32 4294901760, %v1067_v24 }
 0x23f   :  { %2154 = vmatmul.mubr.f32.vlgmr.msra.gmra.mrb[2].mxu1 %v1068_v25 }
 0x240   :  { %2285 = vmatpush3.bf16.msra.mxu1 %v2451_v39  ;;  %2164 = vmatprep.mubr.msk.f32.mxu1 %vm2384_vm0, %v2385_v8 }
 0x241   :  { %2286 = vmatprep.subr.bf16.mxu1 %v2383_v3 }
 0x244   :  { %2288 = vmatpush3.bf16.msra.mxu1 %v2454_v43 }
 0x245   :  { %2289 = vmatprep.subr.bf16.mxu1 %v2383_v3 }
 0x247   :  { %2165 = vmatmul.mubr.f32.vlgmr.msra.gmra.mrb[2].mxu1 %v1064_v21 }
 0x248   :  { %2291 = vmatpush3.bf16.msra.mxu1 %v2460_v44  ;;  %2175 = vmatprep.mubr.msk.f32.mxu1 %vm2384_vm0, %v2385_v8 }
 0x249   :  { %2292 = vmatprep.subr.bf16.mxu1 %v2383_v3 }
 0x24c   :  { %2294 = vmatpush3.bf16.msra.mxu1 %v2464_v45 }
 0x24d   :  { %2295 = vmatprep.subr.bf16.mxu1 %v2383_v3 }
 0x24f   :  { %2176 = vmatmul.mubr.f32.vlgmr.msra.gmra.mrb[2].mxu1 %v1065_v22 }
 0x250   :  { %2297 = vmatpush3.bf16.msra.mxu1 %v2440_v11  ;;  %2186 = vmatprep.mubr.msk.f32.mxu1 %vm2384_vm0, %v2385_v8 }
 0x251   :  { %2298 = vmatprep.subr.bf16.mxu1 %v2383_v3 }
 0x254   :  { %2300 = vmatpush3.bf16.msra.mxu1 %v2445_v14 }
 0x255   :  { %2301 = vmatprep.subr.bf16.mxu1 %v2383_v3 }
 0x257   :  { %2187 = vmatmul.mubr.f32.vlgmr.msra.gmra.mrb[2].mxu1 %v1066_v23 }
 0x258   :  { %2303 = vmatpush3.bf16.msra.mxu1 %v2476_v46  ;;  %2197 = vmatprep.mubr.msk.f32.mxu1 %vm2384_vm0, %v2385_v8 }
 0x259   :  { %2304 = vmatprep.subr.bf16.mxu1 %v2383_v3 }
 0x25c   :  { %2306 = vmatpush3.bf16.msra.mxu1 %v2480_v47 }
 0x25d   :  { %2307 = vmatprep.subr.bf16.mxu1 %v2383_v3 }
 0x25f   :  { %2198 = vmatmul.mubr.f32.vlgmr.msra.gmra.mrb[2].mxu1 %v1064_v21 }
 0x260   :  { %2309 = vmatpush3.bf16.msra.mxu1 %v2440_v11  ;;  %2208 = vmatprep.mubr.msk.f32.mxu1 %vm2384_vm0, %v2385_v8 }
 0x261   :  { %2310 = vmatprep.subr.bf16.mxu1 %v2383_v3 }
 0x264   :  { %2312 = vmatpush3.bf16.msra.mxu1 %v2445_v14 }
 0x267   :  { %2209 = vmatmul.mubr.f32.vlgmr.msra.gmra.mrb[2].mxu1 %v1064_v21 }
 0x33a   :  { %v1476_v9 = vpop.f32.mrb[2].mxu1 }
 0x33b   :  { %v1481_v26 = vsel %vm524_vm4, %v1476_v9, 0  ;;  %v2210_v27 = vpop.f32.mrb[3].mxu1 }
 0x33c   :  { %v1549_v28 = vand.u32 4294901760, %v1481_v26 }
 0x33e   :  { %v1550_v29 = vsub.f32 %v1481_v26, %v1549_v28 }
 0x340   :  { %v1551_v30 = vand.u32 4294901760, %v1550_v29 }
 0x342   :  { %v1552_v31 = vsub.f32 %v1550_v29, %v1551_v30 }
 0x344   :  { %v1553_v32 = vand.u32 4294901760, %v1552_v31 }
 0x346   :  { %2214 = vmatmul.mubr.f32.vlgmr.msra.gmra.mrb[2].mxu0 %v1553_v32 }
 0x347   :  { %2217 = vmatpush3.msra.mxu0 %v2513_v61  ;;  %2218 = vmatprep.mubr.msk.f32.mxu0 %vm2384_vm0, %v2385_v8 }
 0x348   :  { %2221 = vmatprep.subr.mxu0 %v2385_v8 }
 0x34e   :  { %2219 = vmatmul.mubr.f32.vlgmr.msra.gmra.mrb[2].mxu0 %v1549_v28 }
 0x34f   :  { %2222 = vmatpush3.msra.mxu0 %v2505_v51  ;;  %2223 = vmatprep.mubr.msk.f32.mxu0 %vm2384_vm0, %v2385_v8 }
 0x350   :  { %2226 = vmatprep.subr.mxu0 %v2385_v8 }
 0x356   :  { %2224 = vmatmul.mubr.f32.vlgmr.msra.gmra.mrb[2].mxu0 %v1550_v29 }
 0x357   :  { %2227 = vmatpush3.msra.mxu0 %v2498_v50  ;;  %2228 = vmatprep.mubr.msk.f32.mxu0 %vm2384_vm0, %v2385_v8 }
 0x358   :  { %2231 = vmatprep.subr.mxu0 %v2385_v8 }
 0x35e   :  { %2229 = vmatmul.mubr.f32.vlgmr.msra.gmra.mrb[2].mxu0 %v1551_v30 }
 0x35f   :  { %2232 = vmatpush3.msra.mxu0 %v2509_v55  ;;  %2233 = vmatprep.mubr.msk.f32.mxu0 %vm2384_vm0, %v2385_v8 }
 0x360   :  { %2236 = vmatprep.subr.mxu0 %v2385_v8 }
 0x366   :  { %2234 = vmatmul.mubr.f32.vlgmr.msra.gmra.mrb[2].mxu0 %v1549_v28 }
 0x367   :  { %2237 = vmatpush3.msra.mxu0 %v2498_v50  ;;  %2238 = vmatprep.mubr.msk.f32.mxu0 %vm2384_vm0, %v2385_v8 }
 0x36e   :  { %2239 = vmatmul.mubr.f32.vlgmr.msra.gmra.mrb[2].mxu0 %v1549_v28 }
 0x441   :  { %v1925_v3 = vpop.f32.mrb[2].mxu0 }
 0x442   :  { %v1929_v11 = vmul.f32 0.0625, %v1925_v3  ;;  %v2240_v14 = vpop.f32.mrb[3].mxu0 }
 0x444   :  { %v1930_v33 = vadd.f32 0.0001, %v1929_v11 }
 0x446   :  { %2357 = vrsqrt.f32 %v1930_v33 }
 0x450   :  { %v2358_v35 = vpop.eup %2357 }
 0x451   :  { %v1933_v36 = vmul.f32 %v2358_v35, %v1932_v34 }
 0x453   :  { %v1938_v37 = vrot.slane %v1933_v36, %v981_v1 }
 0x455   :  { %v1940_v8 = vmul.f32 %v1938_v37, %v2547_v7 }
 0x457   :  { %v1948_v39 = vadd.f32 %v1964_v38, %v1940_v8 }
 0x459   :  { %1949 = vst.msk [vmem:[#allocation2] sm:$0x3] %vm22_vm1, %v1948_v39 }
 0x45a   :  { %2370 = shalt.err (!%p2367_p4)
}
 0x45b   :  { %s2371_s10 = scalar_lea.hbm %s2629_s5, 32 }
 0x45c   :  { %p2372_p5 = scmp.ne.s32.totalorder %s2629_s5, %s2371_s10  ;;  %p2375_p6 = scmp.lt.u32.totalorder %s2371_s10, %s2629_s5 }
 0x45e   :  { %p2377_p7 = pnand %p2375_p6, %p2372_p5 }
 0x460   :  { %2380 = shalt.err (!%p2377_p7)
}
 0x461   :  { %1959 = dma.vmem_to_hbm [thread:$0]  %s1957_s7, 32, %s2629_s5, [#allocation3]  }
 0x462   :  { %2381 = dma.done.wait [#allocation3], 32  }
 0x463   :  { %2382 = vsyncadd [#allocation3], 4294967264 }
 0x464   :  { %1963 = vsyncpa [#allocation3], 1 }

</bundles_post_ra>
